<compile_context>
chip_gen: v7x
topology: tpu7x:2x2x1
jax: 0.10.0
libtpu: 0.0.40
codegen_flags: <defaults>
</compile_context>

<pallas_src>
import numpy as np
import jax
import jax.numpy as jnp
from jax import lax
from jax.experimental import pallas as pl
from jax.experimental.pallas import tpu as pltpu


# ----------------------------- static subset structure -----------------------------
def sources_and_subsets_nodes(N):
    str1 = '{0:{fill}' + str(N) + 'b}'
    a = [str1.format(i, fill='0') for i in range(1, 2 ** N)]
    sourcesInNode, sourcesNotInNode, subset = [], [], []
    sourceList = list(range(N))

    def node_subset(node, sourcesInNodes):
        return [node - 2 ** i for i in sourcesInNodes]

    def string_to_integer_array(s, ch):
        n = len(s)
        return [n - i - 1 for i, ltr in enumerate(s) if ltr == ch]

    for j in range(len(a)):
        idxLR = string_to_integer_array(a[j], '1')
        sourcesInNode.append(idxLR)
        sourcesNotInNode.append(list(set(sourceList) - set(idxLR)))
        subset.append(node_subset(j, idxLR))
    return sourcesInNode, subset


# ----------------------------- fuzzy measure (parameter-only, plain JAX) -------------
def chi_nn_vars(chi_vars, subset, n_out):
    # Sequential monotone construction over the static subset lattice (no batch data).
    chi_vars = jnp.abs(chi_vars)
    nVars = chi_vars.shape[0]
    fm_rows = [chi_vars[0]]
    for i in range(1, nVars):
        indices = [int(j) for j in subset[i]]
        if len(indices) == 1:
            fm_rows.append(chi_vars[i])
        else:
            maxVal = jnp.max(jnp.stack([fm_rows[j] for j in indices], axis=0), axis=0)
            fm_rows.append(maxVal + chi_vars[i])
    fm_rows.append(jnp.ones((n_out,), dtype=chi_vars.dtype))
    FM = jnp.stack(fm_rows, axis=0)
    FM = jnp.minimum(FM, jnp.float32(1.0))
    return FM  # (2**N_in - 1, N_out)


# ----------------------------- Pallas kernel -----------------------------------------
def choquet_kernel(x_ref, fm_ref, o_ref):
    """
    x_ref : (N_in,  cps, 8, 128) VMEM  -- batch packed over (chunk, sublane, lane)
    fm_ref: (N_out, 2**N_in - 1) SMEM  -- FM^T, read as loop-invariant scalars
    o_ref : (N_out, cps, 8, 128) VMEM  -- dense (8,128) stores per output
    """
    n_in, cps = x_ref.shape[0], x_ref.shape[1]
    n_out = o_ref.shape[0]
    full = 2 ** n_in - 1                       # bitmask of the full source set
    # Hoist the tiny FM scalar reads (loop-invariant) out of the chunk loop.
    fm = [[fm_ref[o, s] for s in range(full)] for o in range(n_out)]

    def body(c, carry):
        # Per-feature tiles, each a dense (8, 128) f32 vreg.
        rows = [x_ref[j, c].astype(jnp.float32) for j in range(n_in)]

        # Subset-lattice min / max recursion (shared partials, <40 live vregs).
        min_sub = [None] * (full + 1)
        max_sub = [None] * (full + 1)
        for s in range(1, full + 1):
            lsb = s & (-s)
            j = lsb.bit_length() - 1
            rest = s - lsb
            if rest == 0:
                min_sub[s] = rows[j]
                max_sub[s] = rows[j]
            else:
                min_sub[s] = jnp.minimum(rows[j], min_sub[rest])
                if s != full:                  # max over the full set is never needed
                    max_sub[s] = jnp.maximum(rows[j], max_sub[rest])

        # data[S] = relu(min_in(S) - max_out(S)); full set uses the raw min (complement
        # is empty, matching the reference's appended-zero sorted value exactly).
        # Contract against FM^T on the fly -> never materialise the subset slab.
        accs = [fm[o][full - 1] * min_sub[full] for o in range(n_out)]
        for s in range(1, full):
            d = jnp.maximum(min_sub[s] - max_sub[full ^ s], jnp.float32(0.0))
            for o in range(n_out):
                accs[o] = accs[o] + fm[o][s - 1] * d

        for o in range(n_out):
            o_ref[o, c] = accs[o].astype(o_ref.dtype)   # dense (8,128) store
        return carry

    lax.fori_loop(0, cps, body, jnp.int32(0))


# ----------------------------- wrapper ------------------------------------------------
_LANE_CHUNK = 128                 # lanes per compute chunk (keeps live set < 64 vregs)
_CHUNK = 8 * _LANE_CHUNK          # 1024 batch rows per (8, 128) compute chunk


def _round_up(a, b):
    return ((a + b - 1) // b) * b


def choquet_pallas(inputs, FM, *, tm=4096):
    """inputs: (M, N_in), FM: (2**N_in - 1, N_out) -> ChI: (M, N_out)."""
    M, n_in = inputs.shape
    n_subsets, n_out = FM.shape
    assert n_subsets == 2 ** n_in - 1
    # TODO(synk): for N_in >= ~8 the unrolled 2**N_in subset lattice gets large; switch
    # to a per-k FM lookup formulation before reusing this kernel at that width.

    # ---- tile selection: big DMA tiles, but >= 2 grid steps when there is enough work
    work = _round_up(M, _CHUNK)
    tm = min(_round_up(max(tm, _CHUNK), _CHUNK), work)
    if work >= 2 * _CHUNK:        # v7x megacore: give both TensorCores at least a step
        tm = min(tm, _round_up(work // 2, _CHUNK))
    m_pad = _round_up(M, tm)
    grid = m_pad // tm
    cps = tm // _CHUNK            # compute chunks per grid step
    c_total = m_pad // _CHUNK

    x = inputs.astype(jnp.float32)
    if m_pad != M:
        x = jnp.pad(x, ((0, m_pad - M), (0, 0)))   # zero rows -> zero outputs, sliced off

    # Layout plumbing: batch packed as (chunk, sublane, lane).  The (M,N)->(N,M)
    # transpose is one wrapper-side HBM pass; the reshape after it is free.
    # TODO(synk): drop both transposes if the producer/consumer can use (N_in,M)/(N_out,M).
    x4 = jnp.transpose(x).reshape(n_in, c_total, 8, _LANE_CHUNK)
    fm_t = jnp.transpose(FM.astype(jnp.float32))   # (N_out, n_subsets), tiny -> SMEM

    out4 = pl.pallas_call(
        choquet_kernel,
        out_shape=jax.ShapeDtypeStruct((n_out, c_total, 8, _LANE_CHUNK), jnp.float32),
        grid_spec=pltpu.PrefetchScalarGridSpec(
            num_scalar_prefetch=0,
            grid=(grid,),
            in_specs=[
                pl.BlockSpec((n_in, cps, 8, _LANE_CHUNK), lambda i: (0, i, 0, 0)),
                pl.BlockSpec(memory_space=pltpu.MemorySpace.SMEM),   # FM^T scalars
            ],
            out_specs=pl.BlockSpec((n_out, cps, 8, _LANE_CHUNK), lambda i: (0, i, 0, 0)),
        ),
        compiler_params=pltpu.CompilerParams(dimension_semantics=("parallel",)),
    )(x4, fm_t)

    return jnp.transpose(out4.reshape(n_out, m_pad))[:M, :]       # (M, N_out)


# ----------------------------- reference (numpy) --------------------------------------
def ref_forward(x_np, FM_np):
    M, N = x_np.shape
    sort_idx = np.argsort(-x_np, axis=1, kind='stable')
    sort_vals = np.take_along_axis(x_np, sort_idx, axis=1)
    sv = np.concatenate([sort_vals, np.zeros((M, 1), dtype=x_np.dtype)], axis=1)
    diffs = sv[:, :-1] - sv[:, 1:]
    out_idx = np.cumsum(2 ** sort_idx, axis=1) - 1
    data = np.zeros((M, FM_np.shape[0]), dtype=np.float32)
    for i in range(M):
        data[i, out_idx[i, :]] = diffs[i, :]
    return data @ FM_np


if __name__ == "__main__":
    N_in, N_out = 4, 3
    nVars = 2 ** N_in - 2                      # 14
    _, subset = sources_and_subsets_nodes(N_in)

    # Deterministic parameter init, identical to the module's __init__.
    chi_vars = (1.0 / N_in) * jnp.ones((nVars, N_out), dtype=jnp.float32)
    FM = chi_nn_vars(chi_vars, subset, N_out)  # (2**N_in - 1, N_out) = (15, 3)

    key = jax.random.PRNGKey(0)
    kx, kx2, kv = jax.random.split(key, 3)

    # --- small demo batch ------------------------------------------------------------
    M = 256
    x = jax.random.uniform(kx, (M, N_in), dtype=jnp.float32)
    out = jax.block_until_ready(choquet_pallas(x, FM))
    ref = ref_forward(np.asarray(x), np.asarray(FM))
    assert out.shape == (M, N_out)
    assert np.allclose(np.asarray(out), ref, atol=1e-5, rtol=1e-5), \
        float(np.max(np.abs(np.asarray(out) - ref)))

    # --- exact-ties robustness (closed-form slab vs sort/scatter reference) -----------
    x_tie = jnp.round(x * 4.0) / 4.0           # forces many exact ties per row
    out_tie = jax.block_until_ready(choquet_pallas(x_tie, FM))
    ref_tie = ref_forward(np.asarray(x_tie), np.asarray(FM))
    assert np.allclose(np.asarray(out_tie), ref_tie, atol=1e-5, rtol=1e-5)

    # --- ragged batch, 2 grid steps, multi-chunk inner loop, non-symmetric FM ---------
    M2 = 2500
    x2 = jax.random.uniform(kx2, (M2, N_in), dtype=jnp.float32)
    chi_vars2 = jax.random.uniform(kv, (nVars, N_out), dtype=jnp.float32)
    FM2 = chi_nn_vars(chi_vars2, subset, N_out)
    out2 = jax.block_until_ready(choquet_pallas(x2, FM2))
    ref2 = ref_forward(np.asarray(x2), np.asarray(FM2))
    assert out2.shape == (M2, N_out)
    assert np.allclose(np.asarray(out2), ref2, atol=1e-5, rtol=1e-5)

    print("KERNEL_OK")
</pallas_src>

<mosaic_0001>
module attributes {stable_mosaic.version = 11 : i64} {
  func.func @choquet_kernel(%arg0: i32, %arg1: memref<4x1x8x128xf32, #tpu.memory_space<vmem>>, %arg2: memref<3x15xf32, #tpu.memory_space<smem>>, %arg3: memref<3x1x8x128xf32, #tpu.memory_space<vmem>>) attributes {dimension_semantics = [#tpu.dimension_semantics<parallel>], iteration_bounds = array<i64: 1>, scalar_prefetch = 0 : i64, scratch_operands = 0 : i64, tpu.core_type = #tpu.core_type<tc>, window_params = [{transform_indices = @transform_0, window_bounds = array<i64: 4, 1, 8, 128>}, {transform_indices = @transform_1, window_bounds = array<i64: 3, 15>}, {transform_indices = @transform_2, window_bounds = array<i64: 3, 1, 8, 128>}]} {
    %c0 = arith.constant 0 : index
    %c0_0 = arith.constant 0 : index
    %0 = memref.load %arg2[%c0, %c0_0] : memref<3x15xf32, #tpu.memory_space<smem>>
    %c0_1 = arith.constant 0 : index
    %c1 = arith.constant 1 : index
    %1 = memref.load %arg2[%c0_1, %c1] : memref<3x15xf32, #tpu.memory_space<smem>>
    %c0_2 = arith.constant 0 : index
    %c2 = arith.constant 2 : index
    %2 = memref.load %arg2[%c0_2, %c2] : memref<3x15xf32, #tpu.memory_space<smem>>
    %c0_3 = arith.constant 0 : index
    %c3 = arith.constant 3 : index
    %3 = memref.load %arg2[%c0_3, %c3] : memref<3x15xf32, #tpu.memory_space<smem>>
    %c0_4 = arith.constant 0 : index
    %c4 = arith.constant 4 : index
    %4 = memref.load %arg2[%c0_4, %c4] : memref<3x15xf32, #tpu.memory_space<smem>>
    %c0_5 = arith.constant 0 : index
    %c5 = arith.constant 5 : index
    %5 = memref.load %arg2[%c0_5, %c5] : memref<3x15xf32, #tpu.memory_space<smem>>
    %c0_6 = arith.constant 0 : index
    %c6 = arith.constant 6 : index
    %6 = memref.load %arg2[%c0_6, %c6] : memref<3x15xf32, #tpu.memory_space<smem>>
    %c0_7 = arith.constant 0 : index
    %c7 = arith.constant 7 : index
    %7 = memref.load %arg2[%c0_7, %c7] : memref<3x15xf32, #tpu.memory_space<smem>>
    %c0_8 = arith.constant 0 : index
    %c8 = arith.constant 8 : index
    %8 = memref.load %arg2[%c0_8, %c8] : memref<3x15xf32, #tpu.memory_space<smem>>
    %c0_9 = arith.constant 0 : index
    %c9 = arith.constant 9 : index
    %9 = memref.load %arg2[%c0_9, %c9] : memref<3x15xf32, #tpu.memory_space<smem>>
    %c0_10 = arith.constant 0 : index
    %c10 = arith.constant 10 : index
    %10 = memref.load %arg2[%c0_10, %c10] : memref<3x15xf32, #tpu.memory_space<smem>>
    %c0_11 = arith.constant 0 : index
    %c11 = arith.constant 11 : index
    %11 = memref.load %arg2[%c0_11, %c11] : memref<3x15xf32, #tpu.memory_space<smem>>
    %c0_12 = arith.constant 0 : index
    %c12 = arith.constant 12 : index
    %12 = memref.load %arg2[%c0_12, %c12] : memref<3x15xf32, #tpu.memory_space<smem>>
    %c0_13 = arith.constant 0 : index
    %c13 = arith.constant 13 : index
    %13 = memref.load %arg2[%c0_13, %c13] : memref<3x15xf32, #tpu.memory_space<smem>>
    %c0_14 = arith.constant 0 : index
    %c14 = arith.constant 14 : index
    %14 = memref.load %arg2[%c0_14, %c14] : memref<3x15xf32, #tpu.memory_space<smem>>
    %c1_15 = arith.constant 1 : index
    %c0_16 = arith.constant 0 : index
    %15 = memref.load %arg2[%c1_15, %c0_16] : memref<3x15xf32, #tpu.memory_space<smem>>
    %c1_17 = arith.constant 1 : index
    %c1_18 = arith.constant 1 : index
    %16 = memref.load %arg2[%c1_17, %c1_18] : memref<3x15xf32, #tpu.memory_space<smem>>
    %c1_19 = arith.constant 1 : index
    %c2_20 = arith.constant 2 : index
    %17 = memref.load %arg2[%c1_19, %c2_20] : memref<3x15xf32, #tpu.memory_space<smem>>
    %c1_21 = arith.constant 1 : index
    %c3_22 = arith.constant 3 : index
    %18 = memref.load %arg2[%c1_21, %c3_22] : memref<3x15xf32, #tpu.memory_space<smem>>
    %c1_23 = arith.constant 1 : index
    %c4_24 = arith.constant 4 : index
    %19 = memref.load %arg2[%c1_23, %c4_24] : memref<3x15xf32, #tpu.memory_space<smem>>
    %c1_25 = arith.constant 1 : index
    %c5_26 = arith.constant 5 : index
    %20 = memref.load %arg2[%c1_25, %c5_26] : memref<3x15xf32, #tpu.memory_space<smem>>
    %c1_27 = arith.constant 1 : index
    %c6_28 = arith.constant 6 : index
    %21 = memref.load %arg2[%c1_27, %c6_28] : memref<3x15xf32, #tpu.memory_space<smem>>
    %c1_29 = arith.constant 1 : index
    %c7_30 = arith.constant 7 : index
    %22 = memref.load %arg2[%c1_29, %c7_30] : memref<3x15xf32, #tpu.memory_space<smem>>
    %c1_31 = arith.constant 1 : index
    %c8_32 = arith.constant 8 : index
    %23 = memref.load %arg2[%c1_31, %c8_32] : memref<3x15xf32, #tpu.memory_space<smem>>
    %c1_33 = arith.constant 1 : index
    %c9_34 = arith.constant 9 : index
    %24 = memref.load %arg2[%c1_33, %c9_34] : memref<3x15xf32, #tpu.memory_space<smem>>
    %c1_35 = arith.constant 1 : index
    %c10_36 = arith.constant 10 : index
    %25 = memref.load %arg2[%c1_35, %c10_36] : memref<3x15xf32, #tpu.memory_space<smem>>
    %c1_37 = arith.constant 1 : index
    %c11_38 = arith.constant 11 : index
    %26 = memref.load %arg2[%c1_37, %c11_38] : memref<3x15xf32, #tpu.memory_space<smem>>
    %c1_39 = arith.constant 1 : index
    %c12_40 = arith.constant 12 : index
    %27 = memref.load %arg2[%c1_39, %c12_40] : memref<3x15xf32, #tpu.memory_space<smem>>
    %c1_41 = arith.constant 1 : index
    %c13_42 = arith.constant 13 : index
    %28 = memref.load %arg2[%c1_41, %c13_42] : memref<3x15xf32, #tpu.memory_space<smem>>
    %c1_43 = arith.constant 1 : index
    %c14_44 = arith.constant 14 : index
    %29 = memref.load %arg2[%c1_43, %c14_44] : memref<3x15xf32, #tpu.memory_space<smem>>
    %c2_45 = arith.constant 2 : index
    %c0_46 = arith.constant 0 : index
    %30 = memref.load %arg2[%c2_45, %c0_46] : memref<3x15xf32, #tpu.memory_space<smem>>
    %c2_47 = arith.constant 2 : index
    %c1_48 = arith.constant 1 : index
    %31 = memref.load %arg2[%c2_47, %c1_48] : memref<3x15xf32, #tpu.memory_space<smem>>
    %c2_49 = arith.constant 2 : index
    %c2_50 = arith.constant 2 : index
    %32 = memref.load %arg2[%c2_49, %c2_50] : memref<3x15xf32, #tpu.memory_space<smem>>
    %c2_51 = arith.constant 2 : index
    %c3_52 = arith.constant 3 : index
    %33 = memref.load %arg2[%c2_51, %c3_52] : memref<3x15xf32, #tpu.memory_space<smem>>
    %c2_53 = arith.constant 2 : index
    %c4_54 = arith.constant 4 : index
    %34 = memref.load %arg2[%c2_53, %c4_54] : memref<3x15xf32, #tpu.memory_space<smem>>
    %c2_55 = arith.constant 2 : index
    %c5_56 = arith.constant 5 : index
    %35 = memref.load %arg2[%c2_55, %c5_56] : memref<3x15xf32, #tpu.memory_space<smem>>
    %c2_57 = arith.constant 2 : index
    %c6_58 = arith.constant 6 : index
    %36 = memref.load %arg2[%c2_57, %c6_58] : memref<3x15xf32, #tpu.memory_space<smem>>
    %c2_59 = arith.constant 2 : index
    %c7_60 = arith.constant 7 : index
    %37 = memref.load %arg2[%c2_59, %c7_60] : memref<3x15xf32, #tpu.memory_space<smem>>
    %c2_61 = arith.constant 2 : index
    %c8_62 = arith.constant 8 : index
    %38 = memref.load %arg2[%c2_61, %c8_62] : memref<3x15xf32, #tpu.memory_space<smem>>
    %c2_63 = arith.constant 2 : index
    %c9_64 = arith.constant 9 : index
    %39 = memref.load %arg2[%c2_63, %c9_64] : memref<3x15xf32, #tpu.memory_space<smem>>
    %c2_65 = arith.constant 2 : index
    %c10_66 = arith.constant 10 : index
    %40 = memref.load %arg2[%c2_65, %c10_66] : memref<3x15xf32, #tpu.memory_space<smem>>
    %c2_67 = arith.constant 2 : index
    %c11_68 = arith.constant 11 : index
    %41 = memref.load %arg2[%c2_67, %c11_68] : memref<3x15xf32, #tpu.memory_space<smem>>
    %c2_69 = arith.constant 2 : index
    %c12_70 = arith.constant 12 : index
    %42 = memref.load %arg2[%c2_69, %c12_70] : memref<3x15xf32, #tpu.memory_space<smem>>
    %c2_71 = arith.constant 2 : index
    %c13_72 = arith.constant 13 : index
    %43 = memref.load %arg2[%c2_71, %c13_72] : memref<3x15xf32, #tpu.memory_space<smem>>
    %c2_73 = arith.constant 2 : index
    %c14_74 = arith.constant 14 : index
    %44 = memref.load %arg2[%c2_73, %c14_74] : memref<3x15xf32, #tpu.memory_space<smem>>
    %c0_i32 = arith.constant 0 : i32
    %c0_75 = arith.constant 0 : index
    %45 = arith.index_cast %c0_i32 : i32 to index
    %c0_76 = arith.constant 0 : index
    %c0_77 = arith.constant 0 : index
    %46 = vector.load %arg1[%c0_75, %45, %c0_76, %c0_77] : memref<4x1x8x128xf32, #tpu.memory_space<vmem>>, vector<1x1x8x128xf32>
    %47 = vector.shape_cast %46 : vector<1x1x8x128xf32> to vector<8x128xf32>
    %c1_78 = arith.constant 1 : index
    %48 = arith.index_cast %c0_i32 : i32 to index
    %c0_79 = arith.constant 0 : index
    %c0_80 = arith.constant 0 : index
    %49 = vector.load %arg1[%c1_78, %48, %c0_79, %c0_80] : memref<4x1x8x128xf32, #tpu.memory_space<vmem>>, vector<1x1x8x128xf32>
    %50 = vector.shape_cast %49 : vector<1x1x8x128xf32> to vector<8x128xf32>
    %c2_81 = arith.constant 2 : index
    %51 = arith.index_cast %c0_i32 : i32 to index
    %c0_82 = arith.constant 0 : index
    %c0_83 = arith.constant 0 : index
    %52 = vector.load %arg1[%c2_81, %51, %c0_82, %c0_83] : memref<4x1x8x128xf32, #tpu.memory_space<vmem>>, vector<1x1x8x128xf32>
    %53 = vector.shape_cast %52 : vector<1x1x8x128xf32> to vector<8x128xf32>
    %c3_84 = arith.constant 3 : index
    %54 = arith.index_cast %c0_i32 : i32 to index
    %c0_85 = arith.constant 0 : index
    %c0_86 = arith.constant 0 : index
    %55 = vector.load %arg1[%c3_84, %54, %c0_85, %c0_86] : memref<4x1x8x128xf32, #tpu.memory_space<vmem>>, vector<1x1x8x128xf32>
    %56 = vector.shape_cast %55 : vector<1x1x8x128xf32> to vector<8x128xf32>
    %57 = arith.minimumf %47, %50 : vector<8x128xf32>
    %58 = arith.maximumf %47, %50 : vector<8x128xf32>
    %59 = arith.minimumf %47, %53 : vector<8x128xf32>
    %60 = arith.maximumf %47, %53 : vector<8x128xf32>
    %61 = arith.minimumf %50, %53 : vector<8x128xf32>
    %62 = arith.maximumf %50, %53 : vector<8x128xf32>
    %63 = arith.minimumf %47, %61 : vector<8x128xf32>
    %64 = arith.maximumf %47, %62 : vector<8x128xf32>
    %65 = arith.minimumf %47, %56 : vector<8x128xf32>
    %66 = arith.maximumf %47, %56 : vector<8x128xf32>
    %67 = arith.minimumf %50, %56 : vector<8x128xf32>
    %68 = arith.maximumf %50, %56 : vector<8x128xf32>
    %69 = arith.minimumf %47, %67 : vector<8x128xf32>
    %70 = arith.maximumf %47, %68 : vector<8x128xf32>
    %71 = arith.minimumf %53, %56 : vector<8x128xf32>
    %72 = arith.maximumf %53, %56 : vector<8x128xf32>
    %73 = arith.minimumf %47, %71 : vector<8x128xf32>
    %74 = arith.maximumf %47, %72 : vector<8x128xf32>
    %75 = arith.minimumf %50, %71 : vector<8x128xf32>
    %76 = arith.maximumf %50, %72 : vector<8x128xf32>
    %77 = arith.minimumf %47, %75 : vector<8x128xf32>
    %78 = vector.broadcast %14 : f32 to vector<8x128xf32>
    %79 = arith.mulf %78, %77 : vector<8x128xf32>
    %80 = vector.broadcast %29 : f32 to vector<8x128xf32>
    %81 = arith.mulf %80, %77 : vector<8x128xf32>
    %82 = vector.broadcast %44 : f32 to vector<8x128xf32>
    %83 = arith.mulf %82, %77 : vector<8x128xf32>
    %84 = arith.subf %47, %76 : vector<8x128xf32>
    %cst = arith.constant 0.000000e+00 : f32
    %85 = vector.broadcast %cst : f32 to vector<8x128xf32>
    %86 = arith.maximumf %84, %85 : vector<8x128xf32>
    %87 = vector.broadcast %0 : f32 to vector<8x128xf32>
    %88 = arith.mulf %87, %86 : vector<8x128xf32>
    %89 = arith.addf %79, %88 : vector<8x128xf32>
    %90 = vector.broadcast %15 : f32 to vector<8x128xf32>
    %91 = arith.mulf %90, %86 : vector<8x128xf32>
    %92 = arith.addf %81, %91 : vector<8x128xf32>
    %93 = vector.broadcast %30 : f32 to vector<8x128xf32>
    %94 = arith.mulf %93, %86 : vector<8x128xf32>
    %95 = arith.addf %83, %94 : vector<8x128xf32>
    %96 = arith.subf %50, %74 : vector<8x128xf32>
    %cst_87 = arith.constant 0.000000e+00 : f32
    %97 = vector.broadcast %cst_87 : f32 to vector<8x128xf32>
    %98 = arith.maximumf %96, %97 : vector<8x128xf32>
    %99 = vector.broadcast %1 : f32 to vector<8x128xf32>
    %100 = arith.mulf %99, %98 : vector<8x128xf32>
    %101 = arith.addf %89, %100 : vector<8x128xf32>
    %102 = vector.broadcast %16 : f32 to vector<8x128xf32>
    %103 = arith.mulf %102, %98 : vector<8x128xf32>
    %104 = arith.addf %92, %103 : vector<8x128xf32>
    %105 = vector.broadcast %31 : f32 to vector<8x128xf32>
    %106 = arith.mulf %105, %98 : vector<8x128xf32>
    %107 = arith.addf %95, %106 : vector<8x128xf32>
    %108 = arith.subf %57, %72 : vector<8x128xf32>
    %cst_88 = arith.constant 0.000000e+00 : f32
    %109 = vector.broadcast %cst_88 : f32 to vector<8x128xf32>
    %110 = arith.maximumf %108, %109 : vector<8x128xf32>
    %111 = vector.broadcast %2 : f32 to vector<8x128xf32>
    %112 = arith.mulf %111, %110 : vector<8x128xf32>
    %113 = arith.addf %101, %112 : vector<8x128xf32>
    %114 = vector.broadcast %17 : f32 to vector<8x128xf32>
    %115 = arith.mulf %114, %110 : vector<8x128xf32>
    %116 = arith.addf %104, %115 : vector<8x128xf32>
    %117 = vector.broadcast %32 : f32 to vector<8x128xf32>
    %118 = arith.mulf %117, %110 : vector<8x128xf32>
    %119 = arith.addf %107, %118 : vector<8x128xf32>
    %120 = arith.subf %53, %70 : vector<8x128xf32>
    %cst_89 = arith.constant 0.000000e+00 : f32
    %121 = vector.broadcast %cst_89 : f32 to vector<8x128xf32>
    %122 = arith.maximumf %120, %121 : vector<8x128xf32>
    %123 = vector.broadcast %3 : f32 to vector<8x128xf32>
    %124 = arith.mulf %123, %122 : vector<8x128xf32>
    %125 = arith.addf %113, %124 : vector<8x128xf32>
    %126 = vector.broadcast %18 : f32 to vector<8x128xf32>
    %127 = arith.mulf %126, %122 : vector<8x128xf32>
    %128 = arith.addf %116, %127 : vector<8x128xf32>
    %129 = vector.broadcast %33 : f32 to vector<8x128xf32>
    %130 = arith.mulf %129, %122 : vector<8x128xf32>
    %131 = arith.addf %119, %130 : vector<8x128xf32>
    %132 = arith.subf %59, %68 : vector<8x128xf32>
    %cst_90 = arith.constant 0.000000e+00 : f32
    %133 = vector.broadcast %cst_90 : f32 to vector<8x128xf32>
    %134 = arith.maximumf %132, %133 : vector<8x128xf32>
    %135 = vector.broadcast %4 : f32 to vector<8x128xf32>
    %136 = arith.mulf %135, %134 : vector<8x128xf32>
    %137 = arith.addf %125, %136 : vector<8x128xf32>
    %138 = vector.broadcast %19 : f32 to vector<8x128xf32>
    %139 = arith.mulf %138, %134 : vector<8x128xf32>
    %140 = arith.addf %128, %139 : vector<8x128xf32>
    %141 = vector.broadcast %34 : f32 to vector<8x128xf32>
    %142 = arith.mulf %141, %134 : vector<8x128xf32>
    %143 = arith.addf %131, %142 : vector<8x128xf32>
    %144 = arith.subf %61, %66 : vector<8x128xf32>
    %cst_91 = arith.constant 0.000000e+00 : f32
    %145 = vector.broadcast %cst_91 : f32 to vector<8x128xf32>
    %146 = arith.maximumf %144, %145 : vector<8x128xf32>
    %147 = vector.broadcast %5 : f32 to vector<8x128xf32>
    %148 = arith.mulf %147, %146 : vector<8x128xf32>
    %149 = arith.addf %137, %148 : vector<8x128xf32>
    %150 = vector.broadcast %20 : f32 to vector<8x128xf32>
    %151 = arith.mulf %150, %146 : vector<8x128xf32>
    %152 = arith.addf %140, %151 : vector<8x128xf32>
    %153 = vector.broadcast %35 : f32 to vector<8x128xf32>
    %154 = arith.mulf %153, %146 : vector<8x128xf32>
    %155 = arith.addf %143, %154 : vector<8x128xf32>
    %156 = arith.subf %63, %56 : vector<8x128xf32>
    %cst_92 = arith.constant 0.000000e+00 : f32
    %157 = vector.broadcast %cst_92 : f32 to vector<8x128xf32>
    %158 = arith.maximumf %156, %157 : vector<8x128xf32>
    %159 = vector.broadcast %6 : f32 to vector<8x128xf32>
    %160 = arith.mulf %159, %158 : vector<8x128xf32>
    %161 = arith.addf %149, %160 : vector<8x128xf32>
    %162 = vector.broadcast %21 : f32 to vector<8x128xf32>
    %163 = arith.mulf %162, %158 : vector<8x128xf32>
    %164 = arith.addf %152, %163 : vector<8x128xf32>
    %165 = vector.broadcast %36 : f32 to vector<8x128xf32>
    %166 = arith.mulf %165, %158 : vector<8x128xf32>
    %167 = arith.addf %155, %166 : vector<8x128xf32>
    %168 = arith.subf %56, %64 : vector<8x128xf32>
    %cst_93 = arith.constant 0.000000e+00 : f32
    %169 = vector.broadcast %cst_93 : f32 to vector<8x128xf32>
    %170 = arith.maximumf %168, %169 : vector<8x128xf32>
    %171 = vector.broadcast %7 : f32 to vector<8x128xf32>
    %172 = arith.mulf %171, %170 : vector<8x128xf32>
    %173 = arith.addf %161, %172 : vector<8x128xf32>
    %174 = vector.broadcast %22 : f32 to vector<8x128xf32>
    %175 = arith.mulf %174, %170 : vector<8x128xf32>
    %176 = arith.addf %164, %175 : vector<8x128xf32>
    %177 = vector.broadcast %37 : f32 to vector<8x128xf32>
    %178 = arith.mulf %177, %170 : vector<8x128xf32>
    %179 = arith.addf %167, %178 : vector<8x128xf32>
    %180 = arith.subf %65, %62 : vector<8x128xf32>
    %cst_94 = arith.constant 0.000000e+00 : f32
    %181 = vector.broadcast %cst_94 : f32 to vector<8x128xf32>
    %182 = arith.maximumf %180, %181 : vector<8x128xf32>
    %183 = vector.broadcast %8 : f32 to vector<8x128xf32>
    %184 = arith.mulf %183, %182 : vector<8x128xf32>
    %185 = arith.addf %173, %184 : vector<8x128xf32>
    %186 = vector.broadcast %23 : f32 to vector<8x128xf32>
    %187 = arith.mulf %186, %182 : vector<8x128xf32>
    %188 = arith.addf %176, %187 : vector<8x128xf32>
    %189 = vector.broadcast %38 : f32 to vector<8x128xf32>
    %190 = arith.mulf %189, %182 : vector<8x128xf32>
    %191 = arith.addf %179, %190 : vector<8x128xf32>
    %192 = arith.subf %67, %60 : vector<8x128xf32>
    %cst_95 = arith.constant 0.000000e+00 : f32
    %193 = vector.broadcast %cst_95 : f32 to vector<8x128xf32>
    %194 = arith.maximumf %192, %193 : vector<8x128xf32>
    %195 = vector.broadcast %9 : f32 to vector<8x128xf32>
    %196 = arith.mulf %195, %194 : vector<8x128xf32>
    %197 = arith.addf %185, %196 : vector<8x128xf32>
    %198 = vector.broadcast %24 : f32 to vector<8x128xf32>
    %199 = arith.mulf %198, %194 : vector<8x128xf32>
    %200 = arith.addf %188, %199 : vector<8x128xf32>
    %201 = vector.broadcast %39 : f32 to vector<8x128xf32>
    %202 = arith.mulf %201, %194 : vector<8x128xf32>
    %203 = arith.addf %191, %202 : vector<8x128xf32>
    %204 = arith.subf %69, %53 : vector<8x128xf32>
    %cst_96 = arith.constant 0.000000e+00 : f32
    %205 = vector.broadcast %cst_96 : f32 to vector<8x128xf32>
    %206 = arith.maximumf %204, %205 : vector<8x128xf32>
    %207 = vector.broadcast %10 : f32 to vector<8x128xf32>
    %208 = arith.mulf %207, %206 : vector<8x128xf32>
    %209 = arith.addf %197, %208 : vector<8x128xf32>
    %210 = vector.broadcast %25 : f32 to vector<8x128xf32>
    %211 = arith.mulf %210, %206 : vector<8x128xf32>
    %212 = arith.addf %200, %211 : vector<8x128xf32>
    %213 = vector.broadcast %40 : f32 to vector<8x128xf32>
    %214 = arith.mulf %213, %206 : vector<8x128xf32>
    %215 = arith.addf %203, %214 : vector<8x128xf32>
    %216 = arith.subf %71, %58 : vector<8x128xf32>
    %cst_97 = arith.constant 0.000000e+00 : f32
    %217 = vector.broadcast %cst_97 : f32 to vector<8x128xf32>
    %218 = arith.maximumf %216, %217 : vector<8x128xf32>
    %219 = vector.broadcast %11 : f32 to vector<8x128xf32>
    %220 = arith.mulf %219, %218 : vector<8x128xf32>
    %221 = arith.addf %209, %220 : vector<8x128xf32>
    %222 = vector.broadcast %26 : f32 to vector<8x128xf32>
    %223 = arith.mulf %222, %218 : vector<8x128xf32>
    %224 = arith.addf %212, %223 : vector<8x128xf32>
    %225 = vector.broadcast %41 : f32 to vector<8x128xf32>
    %226 = arith.mulf %225, %218 : vector<8x128xf32>
    %227 = arith.addf %215, %226 : vector<8x128xf32>
    %228 = arith.subf %73, %50 : vector<8x128xf32>
    %cst_98 = arith.constant 0.000000e+00 : f32
    %229 = vector.broadcast %cst_98 : f32 to vector<8x128xf32>
    %230 = arith.maximumf %228, %229 : vector<8x128xf32>
    %231 = vector.broadcast %12 : f32 to vector<8x128xf32>
    %232 = arith.mulf %231, %230 : vector<8x128xf32>
    %233 = arith.addf %221, %232 : vector<8x128xf32>
    %234 = vector.broadcast %27 : f32 to vector<8x128xf32>
    %235 = arith.mulf %234, %230 : vector<8x128xf32>
    %236 = arith.addf %224, %235 : vector<8x128xf32>
    %237 = vector.broadcast %42 : f32 to vector<8x128xf32>
    %238 = arith.mulf %237, %230 : vector<8x128xf32>
    %239 = arith.addf %227, %238 : vector<8x128xf32>
    %240 = arith.subf %75, %47 : vector<8x128xf32>
    %cst_99 = arith.constant 0.000000e+00 : f32
    %241 = vector.broadcast %cst_99 : f32 to vector<8x128xf32>
    %242 = arith.maximumf %240, %241 : vector<8x128xf32>
    %243 = vector.broadcast %13 : f32 to vector<8x128xf32>
    %244 = arith.mulf %243, %242 : vector<8x128xf32>
    %245 = arith.addf %233, %244 : vector<8x128xf32>
    %246 = vector.broadcast %28 : f32 to vector<8x128xf32>
    %247 = arith.mulf %246, %242 : vector<8x128xf32>
    %248 = arith.addf %236, %247 : vector<8x128xf32>
    %249 = vector.broadcast %43 : f32 to vector<8x128xf32>
    %250 = arith.mulf %249, %242 : vector<8x128xf32>
    %251 = arith.addf %239, %250 : vector<8x128xf32>
    %c0_100 = arith.constant 0 : index
    %252 = arith.index_cast %c0_i32 : i32 to index
    %c0_101 = arith.constant 0 : index
    %c0_102 = arith.constant 0 : index
    %253 = vector.load %arg3[%c0_100, %252, %c0_101, %c0_102] : memref<3x1x8x128xf32, #tpu.memory_space<vmem>>, vector<1x1x8x128xf32>
    %254 = vector.shape_cast %253 : vector<1x1x8x128xf32> to vector<8x128xf32>
    %255 = vector.shape_cast %245 : vector<8x128xf32> to vector<1x1x8x128xf32>
    tpu.vector_store %arg3[%c0_100, %252, %c0_101, %c0_102], %255 {strides = array<i32>} : memref<3x1x8x128xf32, #tpu.memory_space<vmem>>, vector<1x1x8x128xf32>,
    %c1_103 = arith.constant 1 : index
    %256 = arith.index_cast %c0_i32 : i32 to index
    %c0_104 = arith.constant 0 : index
    %c0_105 = arith.constant 0 : index
    %257 = vector.load %arg3[%c1_103, %256, %c0_104, %c0_105] : memref<3x1x8x128xf32, #tpu.memory_space<vmem>>, vector<1x1x8x128xf32>
    %258 = vector.shape_cast %257 : vector<1x1x8x128xf32> to vector<8x128xf32>
    %259 = vector.shape_cast %248 : vector<8x128xf32> to vector<1x1x8x128xf32>
    tpu.vector_store %arg3[%c1_103, %256, %c0_104, %c0_105], %259 {strides = array<i32>} : memref<3x1x8x128xf32, #tpu.memory_space<vmem>>, vector<1x1x8x128xf32>,
    %c2_106 = arith.constant 2 : index
    %260 = arith.index_cast %c0_i32 : i32 to index
    %c0_107 = arith.constant 0 : index
    %c0_108 = arith.constant 0 : index
    %261 = vector.load %arg3[%c2_106, %260, %c0_107, %c0_108] : memref<3x1x8x128xf32, #tpu.memory_space<vmem>>, vector<1x1x8x128xf32>
    %262 = vector.shape_cast %261 : vector<1x1x8x128xf32> to vector<8x128xf32>
    %263 = vector.shape_cast %251 : vector<8x128xf32> to vector<1x1x8x128xf32>
    tpu.vector_store %arg3[%c2_106, %260, %c0_107, %c0_108], %263 {strides = array<i32>} : memref<3x1x8x128xf32, #tpu.memory_space<vmem>>, vector<1x1x8x128xf32>,
    %c1_i32 = arith.constant 1 : i32
    return
  }
  func.func @transform_0(%arg0: i32) -> (i32, i32, i32, i32) {
    %c0_i32 = arith.constant 0 : i32
    %c0_i32_0 = arith.constant 0 : i32
    %c0_i32_1 = arith.constant 0 : i32
    %c0_i32_2 = arith.constant 0 : i32
    return %c0_i32, %arg0, %c0_i32_0, %c0_i32_1 : i32, i32, i32, i32
  }
  func.func @transform_1(%arg0: i32) -> (i32, i32) {
    %c0_i32 = arith.constant 0 : i32
    %c0_i32_0 = arith.constant 0 : i32
    %c0_i32_1 = arith.constant 0 : i32
    return %c0_i32, %c0_i32_0 : i32, i32
  }
  func.func @transform_2(%arg0: i32) -> (i32, i32, i32, i32) {
    %c0_i32 = arith.constant 0 : i32
    %c0_i32_0 = arith.constant 0 : i32
    %c0_i32_1 = arith.constant 0 : i32
    %c0_i32_2 = arith.constant 0 : i32
    return %c0_i32, %arg0, %c0_i32_0, %c0_i32_1 : i32, i32, i32, i32
  }
}

</mosaic_0001>

<bundles_post_ra>
// kernel: tpu_custom_call.1
= control target key start
LH: loop header
LB: loop body
LE: loop exit
PB: predicated region body
PF: predicated region fallthrough
CT: control target
= control target key end

     0   :  { %7 = vsyncpa [#allocation3], 0  ;;  %s734_s0 = inlined_call_operand.hbm [shape: f32[4,1,8,128], index: 0, kind: input, shape index: {}]   ;;  %s735_s1 = inlined_call_operand.hbm [shape: f32[3,15], index: 1, kind: input, shape index: {}]   ;;  %s736_s2 = inlined_call_operand.hbm [shape: f32[3,1,8,128], index: 2, kind: output, shape index: {}]  }
   0x1   :  { %8 = vsyncpa [#allocation5], 0 }
   0x2   :  { %9 = vsyncpa [#allocation4], 0  ;;  %s402_s9 = smov [#allocation2]   ;;  %s342_s13 = scalar_lea.hbm %s734_s0, 512 }
   0x3   :  { %s15_s10 = sshll.u32 %s402_s9, 4  ;;  %p343_p0 = scmp.ne.s32.totalorder %s734_s0, %s342_s13  ;;  %s16_s10 = int_to_ptr.vmem [resolvable:$true] %s15_s10 }
   0x4   :  { %p346_p1 = scmp.lt.u32.totalorder %s342_s13, %s734_s0 }
   0x6   :  { %p348_p2 = pnand %p346_p1, %p343_p0 }
   0x8   :  { %351 = shalt.err (!%p348_p2)
}
   0x9   :  { %s352_s18 = scalar_lea.vmem %s16_s10, 512  ;;  %p357_p4 = scmp.lt.s32.totalorder %s16_s10, %s16_s10 }
   0xa   :  { %p353_p3 = scmp.ne.s32.totalorder %s16_s10, %s352_s18  ;;  %p358_p5 = scmp.lt.s32.totalorder %s352_s18, %s352_s18 }
   0xc   :  { %p359_p6 = por %p358_p5, %p357_p4 }
   0xe   :  { %p360_p7 = pnand %p359_p6, %p353_p3 }
  0x10   :  { %363 = shalt.err (!%p360_p7)
}
  0x11   :  { %s403_s19 = smov 128   ;;  %s404_s20 = smov 8  }
  0x12   :  { %21 = dma.hbm_to_vmem [thread:$0]  %s734_s0, 512, %s16_s10, [#allocation3], %s403_s19, %s403_s19, %s404_s20  }
  0x13   :  { %s364_s25 = scalar_lea.hbm %s735_s1, 64 }
  0x14   :  { %p365_p8 = scmp.ne.s32.totalorder %s735_s1, %s364_s25  ;;  %p368_p9 = scmp.lt.u32.totalorder %s364_s25, %s735_s1 }
  0x16   :  { %p370_p10 = pnand %p368_p9, %p365_p8 }
  0x18   :  { %373 = shalt.err (!%p370_p10)
}
  0x19   :  { %s405_s30 = smov [#allocation6]  }
  0x1a   :  { %29 = dma.hbm_to_smem %s735_s1, 64, %s405_s30, [#allocation5]  }
  0x1b   :  { %396 = dma.done.wait [#allocation3], 512  }
  0x1c   :  { %397 = vsyncadd [#allocation3], 4294966784 }
  0x1d   :  { %398 = dma.done.wait [#allocation5], 64  }
  0x1e   :  { %399 = vsyncadd [#allocation5], 4294967232 }
  0x1f   :  { %36 = sfence }
  0x20   :  { %s449_s0 = sld [smem:[#allocation6]]  ;;  %v451_v0 = vld [vmem:[#allocation2] sm:$0xff]  ;;  %s453_s5 = sld [smem:[#allocation6 + $0x2]]  ;;  %v455_v1 = vld [vmem:[#allocation2 + $0x8] sm:$0xff]  ;;  %v457_v2 = vld [vmem:[#allocation2 + $0x10] sm:$0xff] }
  0x21   :  { %v459_v3 = vld [vmem:[#allocation2 + $0x18] sm:$0xff]  ;;  %s461_s6 = sld [smem:[#allocation6 + $0x1]]  ;;  %s463_s1 = sld [smem:[#allocation6 + $0x4]]  ;;  %v89_v4 = vmin.f32 %v451_v0, %v455_v1  ;;  %v91_v5 = vmin.f32 %v451_v0, %v457_v2  ;;  %v93_v6 = vmin.f32 %v455_v1, %v457_v2  ;;  %v477_v7 = vmax.f32 %v455_v1, %v457_v2 }
  0x22   :  { %s469_s7 = sld [smem:[#allocation6 + $0x3]]  ;;  %s471_s8 = sld [smem:[#allocation6 + $0x5]]  ;;  %v481_v8 = vmin.f32 %v455_v1, %v459_v3  ;;  %v100_v9 = vmax.f32 %v455_v1, %v459_v3  ;;  %v98_v10 = vmax.f32 %v451_v0, %v459_v3  ;;  %v489_v11 = vmin.f32 %v457_v2, %v459_v3 }
  0x23   :  { %v104_v12 = vmax.f32 %v457_v2, %v459_v3  ;;  %v90_v13 = vmax.f32 %v451_v0, %v455_v1  ;;  %v92_v14 = vmax.f32 %v451_v0, %v457_v2  ;;  %s498_s9 = sld [smem:[#allocation6 + $0x6]]  ;;  %v97_v17 = vmin.f32 %v451_v0, %v459_v3  ;;  %s510_s11 = sld [smem:[#allocation6 + $0x80]] }
  0x24   :  { %v102_v15 = vmax.f32 %v451_v0, %v100_v9  ;;  %v160_v16 = vsub.f32 %v91_v5, %v100_v9  ;;  %v505_v19 = vmin.f32 %v455_v1, %v489_v11  ;;  %s508_s10 = sld [smem:[#allocation6 + $0xe]]  ;;  %v95_v21 = vmin.f32 %v451_v0, %v93_v6  ;;  %s517_s12 = sld [smem:[#allocation6 + $0x81]] }
  0x25   :  { %v106_v18 = vmax.f32 %v451_v0, %v104_v12  ;;  %v108_v20 = vmax.f32 %v455_v1, %v104_v12  ;;  %v96_v22 = vmax.f32 %v451_v0, %v477_v7  ;;  %v101_v23 = vmin.f32 %v451_v0, %v481_v8  ;;  %s519_s13 = sld [smem:[#allocation6 + $0x82]]  ;;  %s524_s14 = sld [smem:[#allocation6 + $0x8e]] }
  0x26   :  { %v138_v24 = vsub.f32 %v89_v4, %v104_v12  ;;  %v149_v27 = vsub.f32 %v457_v2, %v102_v15  ;;  %v171_v28 = vsub.f32 %v93_v6, %v98_v10  ;;  %s526_s15 = sld [smem:[#allocation6 + $0x100]]  ;;  %v118_v29 = vstv %s449_s0  ;;  %s534_s16 = sld [smem:[#allocation6 + $0x101]] }
  0x27   :  { %v116_v25 = vsub.f32 %v451_v0, %v108_v20  ;;  %v127_v26 = vsub.f32 %v455_v1, %v106_v18  ;;  %v140_v31 = vstv %s453_s5  ;;  %v532_v32 = vmax.f32 %v160_v16, 0.0  ;;  %s539_s17 = sld [smem:[#allocation6 + $0x102]]  ;;  %s541_s18 = sld [smem:[#allocation6 + $0x10e]] }
  0x28   :  { %v529_v30 = vmax.f32 %v138_v24, 0.0  ;;  %v109_v33 = vmin.f32 %v451_v0, %v505_v19  ;;  %v162_v36 = vstv %s463_s1  ;;  %v105_v37 = vmin.f32 %v451_v0, %v489_v11  ;;  %s557_s21 = sld [smem:[#allocation6 + $0x7]]  ;;  %s559_s22 = sld [smem:[#allocation6 + $0x8]] }
  0x29   :  { %v117_v34 = vmax.f32 %v116_v25, 0.0  ;;  %v128_v35 = vmax.f32 %v127_v26, 0.0  ;;  %v129_v38 = vstv %s461_s6  ;;  %v151_v39 = vstv %s469_s7  ;;  %s562_s23 = sld [smem:[#allocation6 + $0x9]]  ;;  %s568_s24 = sld [smem:[#allocation6 + $0xa]] }
  0x2a   :  { %v173_v40 = vstv %s471_s8  ;;  %v141_v42 = vmul.f32 %v140_v31, %v529_v30  ;;  %v549_v43 = vmax.f32 %v149_v27, 0.0  ;;  %v182_v44 = vsub.f32 %v95_v21, %v459_v3  ;;  %s575_s25 = sld [smem:[#allocation6 + $0xb]]  ;;  %s586_s27 = sld [smem:[#allocation6 + $0x84]] }
  0x2b   :  { %v119_v41 = vmul.f32 %v118_v29, %v117_v34  ;;  %v110_v45 = vstv %s508_s10  ;;  %v121_v46 = vstv %s510_s11  ;;  %v163_v47 = vmul.f32 %v162_v36, %v532_v32  ;;  %s578_s26 = sld [smem:[#allocation6 + $0x83]]  ;;  %s588_s28 = sld [smem:[#allocation6 + $0x85]] }
  0x2c   :  { %v555_v48 = vmax.f32 %v171_v28, 0.0  ;;  %v111_v49 = vmul.f32 %v110_v45, %v109_v33  ;;  %v122_v50 = vmul.f32 %v121_v46, %v117_v34  ;;  %v130_v51 = vmul.f32 %v129_v38, %v128_v35  ;;  %s590_s29 = sld [smem:[#allocation6 + $0xc]]  ;;  %s605_s30 = sld [smem:[#allocation6 + $0x86]] }
  0x2d   :  { %v132_v52 = vstv %s517_s12  ;;  %v112_v53 = vstv %s524_s14  ;;  %v124_v54 = vstv %s526_s15  ;;  %v143_v56 = vstv %s519_s13  ;;  %s607_s3 = sld [smem:[#allocation6 + $0xd]]  ;;  %s616_s4 = sld [smem:[#allocation6 + $0x87]] }
  0x2e   :  { %v133_v55 = vmul.f32 %v132_v52, %v128_v35  ;;  %v113_v57 = vmul.f32 %v112_v53, %v109_v33  ;;  %v120_v58 = vadd.f32 %v119_v41, %v111_v49  ;;  %v125_v59 = vmul.f32 %v124_v54, %v117_v34  ;;  %s630_s0 = sld [smem:[#allocation6 + $0x88]]  ;;  %s632_s5 = sld [smem:[#allocation6 + $0x89]] }
  0x2f   :  { %v135_v60 = vstv %s534_s16  ;;  %v114_v61 = vstv %s541_s18  ;;  %v152_v62 = vmul.f32 %v151_v39, %v549_v43  ;;  %v572_v63 = vmax.f32 %v182_v44, 0.0  ;;  %s638_s6 = sld [smem:[#allocation6 + $0x8a]]  ;;  %s640_s1 = sld [smem:[#allocation6 + $0x103]] }
  0x30   :  { %v184_v4 = vstv %s498_s9  ;;  %v115_v5 = vmul.f32 %v114_v61, %v109_v33  ;;  %v123_v6 = vadd.f32 %v122_v50, %v113_v57  ;;  %v131_v9 = vadd.f32 %v130_v51, %v120_v58  ;;  %s646_s7 = sld [smem:[#allocation6 + $0x104]]  ;;  %s648_s8 = sld [smem:[#allocation6 + $0x105]] }
  0x31   :  { %v144_v10 = vmul.f32 %v143_v56, %v529_v30  ;;  %v136_v12 = vmul.f32 %v135_v60, %v128_v35  ;;  %v146_v15 = vstv %s539_s17  ;;  %v193_v16 = vsub.f32 %v459_v3, %v96_v22  ;;  %s658_s9 = sld [smem:[#allocation6 + $0x8b]]  ;;  %s662_s10 = sld [smem:[#allocation6 + $0x106]] }
  0x32   :  { %v204_v18 = vsub.f32 %v97_v17, %v477_v7  ;;  %v126_v20 = vadd.f32 %v125_v59, %v115_v5  ;;  %v134_v21 = vadd.f32 %v133_v55, %v123_v6  ;;  %v142_v24 = vadd.f32 %v141_v42, %v131_v9  ;;  %s667_s11 = sld [smem:[#allocation6 + $0x107]]  ;;  %s674_s12 = sld [smem:[#allocation6 + $0x8c]] }
  0x33   :  { %v215_v22 = vsub.f32 %v481_v8, %v92_v14  ;;  %v174_v3 = vmul.f32 %v173_v40, %v555_v48  ;;  %v597_v25 = vmax.f32 %v193_v16, 0.0  ;;  %v226_v17 = vsub.f32 %v101_v23, %v457_v2  ;;  %s677_s13 = sld [smem:[#allocation6 + $0x108]]  ;;  %s681_s14 = sld [smem:[#allocation6 + $0x8d]] }
  0x34   :  { %v599_v7 = vmax.f32 %v204_v18, 0.0  ;;  %v153_v26 = vadd.f32 %v152_v62, %v142_v24  ;;  %v195_v27 = vstv %s557_s21  ;;  %v206_v28 = vstv %s559_s22  ;;  %s684_s15 = sld [smem:[#allocation6 + $0x109]]  ;;  %s693_s16 = sld [smem:[#allocation6 + $0x10a]] }
  0x35   :  { %v611_v29 = vmax.f32 %v215_v22, 0.0  ;;  %v147_v14 = vmul.f32 %v146_v15, %v529_v30  ;;  %v185_v31 = vmul.f32 %v184_v4, %v572_v63  ;;  %v217_v33 = vstv %s562_s23  ;;  %s699_s17 = sld [smem:[#allocation6 + $0x10b]]  ;;  %s334_s18 = sld [smem:[#allocation6 + $0x10c]] }
  0x36   :  { %v137_v34 = vadd.f32 %v136_v12, %v126_v20  ;;  %v145_v2 = vadd.f32 %v144_v10, %v134_v21  ;;  %v164_v8 = vadd.f32 %v163_v47, %v153_v26  ;;  %v237_v23 = vsub.f32 %v489_v11, %v90_v13  ;;  %s335_s21 = sld [smem:[#allocation6 + $0x10d]]  ;;  %s406_s22 = smov [#allocation7]  }
  0x37   :  { %v196_v30 = vmul.f32 %v195_v27, %v597_v25  ;;  %v207_v35 = vmul.f32 %v206_v28, %v599_v7  ;;  %v624_v36 = vmax.f32 %v226_v17, 0.0  ;;  %v248_v38 = vsub.f32 %v105_v37, %v455_v1  ;;  %s280_s23 = sshll.u32 %s406_s22, 4  ;;  %s281_s23 = int_to_ptr.vmem [resolvable:$true] %s280_s23 }
  0x38   :  { %v175_v39 = vadd.f32 %v174_v3, %v164_v8  ;;  %v218_v13 = vmul.f32 %v217_v33, %v611_v29  ;;  %v228_v40 = vstv %s568_s24  ;;  %v259_v41 = vsub.f32 %v505_v19, %v451_v0  ;;  %s374_s24 = scalar_lea.vmem %s281_s23, 384  ;;  %p379_p12 = scmp.lt.s32.totalorder %s281_s23, %s281_s23 }
  0x39   :  { %v239_v42 = vstv %s575_s25  ;;  %v154_v11 = vstv %s578_s26  ;;  %v165_v1 = vstv %s586_s27  ;;  %v176_v37 = vstv %s588_s28  ;;  %p375_p11 = scmp.ne.s32.totalorder %s281_s23, %s374_s24  ;;  %p380_p13 = scmp.lt.s32.totalorder %s374_s24, %s374_s24 }
  0x3a   :  { %v186_v44 = vadd.f32 %v185_v31, %v175_v39  ;;  %v650_v45 = vmax.f32 %v237_v23, 0.0  ;;  %v250_v46 = vstv %s590_s29  ;;  %v155_v0 = vmul.f32 %v154_v11, %v549_v43 }
  0x3b   :  { %v654_v19 = vmax.f32 %v248_v38, 0.0  ;;  %v656_v47 = vmax.f32 %v259_v41, 0.0  ;;  %v166_v49 = vmul.f32 %v165_v1, %v532_v32  ;;  %v187_v50 = vstv %s605_s30  ;;  %p381_p0 = por %p380_p13, %p379_p12 }
  0x3c   :  { %v197_v51 = vadd.f32 %v196_v30, %v186_v44  ;;  %v261_v52 = vstv %s607_s3  ;;  %v156_v53 = vadd.f32 %v155_v0, %v145_v2  ;;  %v177_v54 = vmul.f32 %v176_v37, %v555_v48 }
  0x3d   :  { %v148_v55 = vadd.f32 %v147_v14, %v137_v34  ;;  %v198_v56 = vstv %s616_s4  ;;  %v229_v58 = vmul.f32 %v228_v40, %v624_v36  ;;  %v188_v60 = vmul.f32 %v187_v50, %v572_v63  ;;  %p382_p1 = pnand %p381_p0, %p375_p11 }
  0x3e   :  { %v208_v57 = vadd.f32 %v207_v35, %v197_v51  ;;  %v167_v59 = vadd.f32 %v166_v49, %v156_v53  ;;  %v240_v61 = vmul.f32 %v239_v42, %v650_v45  ;;  %v251_v62 = vmul.f32 %v250_v46, %v654_v19 }
  0x3f   :  { %v262_v4 = vmul.f32 %v261_v52, %v656_v47  ;;  %v209_v5 = vstv %s630_s0  ;;  %v199_v10 = vmul.f32 %v198_v56, %v597_v25  ;;  %v220_v12 = vstv %s632_s5 }
  0x40   :  { %v219_v6 = vadd.f32 %v218_v13, %v208_v57  ;;  %v178_v9 = vadd.f32 %v177_v54, %v167_v59  ;;  %v231_v15 = vstv %s638_s6  ;;  %v157_v16 = vstv %s640_s1 }
  0x41   :  { %v168_v18 = vstv %s646_s7  ;;  %v179_v20 = vstv %s648_s8  ;;  %v210_v22 = vmul.f32 %v209_v5, %v599_v7  ;;  %v158_v3 = vmul.f32 %v157_v16, %v549_v43 }
  0x42   :  { %v230_v21 = vadd.f32 %v229_v58, %v219_v6  ;;  %v189_v24 = vadd.f32 %v188_v60, %v178_v9  ;;  %v221_v17 = vmul.f32 %v220_v12, %v611_v29  ;;  %v242_v26 = vstv %s658_s9 }
  0x43   :  { %v169_v27 = vmul.f32 %v168_v18, %v532_v32  ;;  %v190_v28 = vstv %s662_s10  ;;  %v159_v33 = vadd.f32 %v158_v3, %v148_v55  ;;  %v180_v34 = vmul.f32 %v179_v20, %v555_v48 }
  0x44   :  { %v241_v14 = vadd.f32 %v240_v61, %v230_v21  ;;  %v200_v31 = vadd.f32 %v199_v10, %v189_v24  ;;  %v232_v2 = vmul.f32 %v231_v15, %v624_v36  ;;  %v201_v43 = vstv %s667_s11 }
  0x45   :  { %v170_v30 = vadd.f32 %v169_v27, %v159_v33  ;;  %v191_v35 = vmul.f32 %v190_v28, %v572_v63  ;;  %v243_v32 = vmul.f32 %v242_v26, %v650_v45  ;;  %v253_v38 = vstv %s674_s12 }
  0x46   :  { %v252_v8 = vadd.f32 %v251_v62, %v241_v14  ;;  %v211_v23 = vadd.f32 %v210_v22, %v200_v31  ;;  %v212_v39 = vstv %s677_s13  ;;  %v202_v41 = vmul.f32 %v201_v43, %v597_v25 }
  0x47   :  { %v181_v40 = vadd.f32 %v180_v34, %v170_v30  ;;  %v264_v42 = vstv %s681_s14  ;;  %v223_v11 = vstv %s684_s15  ;;  %v254_v37 = vmul.f32 %v253_v38, %v654_v19 }
  0x48   :  { %v263_v13 = vadd.f32 %v262_v4, %v252_v8  ;;  %v222_v48 = vadd.f32 %v221_v17, %v211_v23  ;;  %v213_v44 = vmul.f32 %v212_v39, %v599_v7  ;;  %v234_v46 = vstv %s693_s16 }
  0x49   :  { %v192_v63 = vadd.f32 %v191_v35, %v181_v40  ;;  %v265_v49 = vmul.f32 %v264_v42, %v656_v47  ;;  %v224_v51 = vmul.f32 %v223_v11, %v611_v29  ;;  %v245_v52 = vstv %s699_s17 }
  0x4a   :  { %270 = vst [vmem:[#allocation7] sm:$0xff] %v263_v13  ;;  %v233_v1 = vadd.f32 %v232_v2, %v222_v48  ;;  %v235_v54 = vmul.f32 %v234_v46, %v624_v36  ;;  %v256_v55 = vstv %s334_s18  ;;  %v246_v58 = vmul.f32 %v245_v52, %v650_v45 }
  0x4b   :  { %v203_v50 = vadd.f32 %v202_v41, %v192_v63  ;;  %v267_v59 = vstv %s335_s21  ;;  %v257_v60 = vmul.f32 %v256_v55, %v654_v19 }
  0x4c   :  { %v244_v0 = vadd.f32 %v243_v32, %v233_v1  ;;  %v268_v62 = vmul.f32 %v267_v59, %v656_v47 }
  0x4d   :  { %v214_v25 = vadd.f32 %v213_v44, %v203_v50 }
  0x4e   :  { %v255_v53 = vadd.f32 %v254_v37, %v244_v0 }
  0x4f   :  { %v225_v57 = vadd.f32 %v224_v51, %v214_v25 }
  0x50   :  { %v266_v56 = vadd.f32 %v265_v49, %v255_v53 }
  0x51   :  { %v236_v7 = vadd.f32 %v235_v54, %v225_v57 }
  0x52   :  { %272 = vst [vmem:[#allocation7 + $0x8] sm:$0xff] %v266_v56 }
  0x53   :  { %v247_v61 = vadd.f32 %v246_v58, %v236_v7 }
  0x55   :  { %v258_v29 = vadd.f32 %v257_v60, %v247_v61 }
  0x57   :  { %v269_v4 = vadd.f32 %v268_v62, %v258_v29 }
  0x59   :  { %274 = vst [vmem:[#allocation7 + $0x10] sm:$0xff] %v269_v4 }
  0x5a   :  { %385 = shalt.err (!%p382_p1)
}
  0x5b   :  { %s386_s27 = scalar_lea.hbm %s736_s2, 384 }
  0x5c   :  { %p387_p2 = scmp.ne.s32.totalorder %s736_s2, %s386_s27  ;;  %p390_p3 = scmp.lt.u32.totalorder %s386_s27, %s736_s2 }
  0x5e   :  { %p392_p4 = pnand %p390_p3, %p387_p2 }
  0x60   :  { %395 = shalt.err (!%p392_p4)
}
  0x61   :  { %286 = dma.vmem_to_hbm [thread:$0]  %s281_s23, 384, %s736_s2, [#allocation4], %s403_s19, %s403_s19, %s404_s20  }
  0x62   :  { %400 = dma.done.wait [#allocation4], 384  }
  0x63   :  { %401 = vsyncadd [#allocation4], 4294966912 }
  0x64   :  { %290 = vsyncpa [#allocation3], 1 }
  0x65   :  { %291 = vsyncpa [#allocation4], 1 }
  0x66   :  { %292 = vsyncpa [#allocation5], 1 }

</bundles_post_ra>
